<compile_context>
chip_gen: v7x
topology: tpu7x:2x2x1
jax: 0.10.0
libtpu: 0.0.40
codegen_flags: <defaults>
</compile_context>

<pallas_src>
import jax
import jax.numpy as jnp
from jax.experimental import pallas as pl
from jax.experimental.pallas import tpu as pltpu

_EPS = 1e-5
_INNER_MLP_MULT = 2


# ------------------------------------------------------------------ kernels --

def _mlp_bn_folded(rep_bf16, gathered_bf16, w1_ref, b1_ref, w2_ref, b2_ref):
    """[rep, gathered] -> Lin(+folded BN) -> ReLU -> Lin(+folded BN) -> ReLU."""
    # Single K=2D matmul on the lane-concatenated input (128-aligned lane pack).
    x = jnp.concatenate([rep_bf16, gathered_bf16], axis=-1)
    h = jnp.dot(x, w1_ref[...], preferred_element_type=jnp.float32) + b1_ref[...]
    h = jnp.maximum(h, 0.0)
    o = jnp.dot(h.astype(jnp.bfloat16), w2_ref[...],
                preferred_element_type=jnp.float32) + b2_ref[...]
    return jnp.maximum(o, 0.0)


def edge_phase_kernel(a_ev_ref, edge_rep_ref, node_rep_ref,
                      w1_ref, b1_ref, w2_ref, b2_ref, edge_out_ref):
    # node -> edge sum-gather for this tile of edges, as one bf16 MXU matmul.
    node2edge = jnp.dot(a_ev_ref[...], node_rep_ref[...],
                        preferred_element_type=jnp.float32)
    edge_out_ref[...] = _mlp_bn_folded(edge_rep_ref[...],
                                       node2edge.astype(jnp.bfloat16),
                                       w1_ref, b1_ref, w2_ref, b2_ref)


def node_phase_kernel(a_ve_ref, node_rep_ref, edge_out_ref,
                      w1_ref, b1_ref, w2_ref, b2_ref, node_out_ref):
    # edge -> node sum-gather for this tile of nodes, as one bf16 MXU matmul.
    edge2node = jnp.dot(a_ve_ref[...], edge_out_ref[...],
                        preferred_element_type=jnp.float32)
    node_out_ref[...] = _mlp_bn_folded(node_rep_ref[...],
                                       edge2node.astype(jnp.bfloat16),
                                       w1_ref, b1_ref, w2_ref, b2_ref)


# ----------------------------------------------------------------- wrapper ---

def _round_up(x, m):
    return ((x + m - 1) // m) * m


def _pad_rows(x, rows):
    pad = rows - x.shape[0]
    return jnp.pad(x, ((0, pad), (0, 0))) if pad else x


def _fold_bn(w, b, bn, eps=_EPS):
    """Fold eval-mode BatchNorm1d into the preceding Linear (x @ w + b)."""
    gamma, beta, mean, var = bn[0], bn[1], bn[2], bn[3]
    scale = gamma * jax.lax.rsqrt(var + eps)                    # (out,)
    w_f = (w * scale[None, :]).astype(jnp.bfloat16)             # MXU operand
    b_f = ((b - mean[None, :]) * scale[None, :] + beta[None, :]).astype(jnp.float32)
    return w_f, b_f


def edge_node_forward(node_rep, edge_rep, a_ev, edge_params, node_params,
                      *, tile_edges=64, tile_nodes=64):
    """Fused Edge_node forward.

    a_ev is the (E, N) edge<-node incidence (row e has 1.0 at each endpoint of
    edge e). The transposed incidence is derived internally and streamed as row
    tiles by the node phase; the caller never passes it.
    """
    # TODO(synk): for very large graphs replace the dense incidence matmuls with
    # a sparse gather (PrefetchScalarGridSpec carrying src/dst indices).
    N, D = node_rep.shape
    E = edge_rep.shape[0]
    H = edge_params[0].shape[1]
    assert D % 128 == 0 and H % 128 == 0, "feature dims must be lane-dense"

    # --- trace-time prep: fold BN, cast MXU operands to bf16, pad rows -------
    e_w1, e_b1 = _fold_bn(edge_params[0], edge_params[1], edge_params[2])
    e_w2, e_b2 = _fold_bn(edge_params[3], edge_params[4], edge_params[5])
    n_w1, n_b1 = _fold_bn(node_params[0], node_params[1], node_params[2])
    n_w2, n_b2 = _fold_bn(node_params[3], node_params[4], node_params[5])

    te = min(tile_edges, _round_up(E, 16))   # bf16 sublane pack = 16
    tn = min(tile_nodes, _round_up(N, 16))
    E_pad = _round_up(E, te)
    N_pad = _round_up(N, tn)

    node_rep_p = _pad_rows(node_rep, N_pad).astype(jnp.bfloat16)
    edge_rep_p = _pad_rows(edge_rep, E_pad).astype(jnp.bfloat16)
    a_ev_p = jnp.pad(a_ev, ((0, E_pad - E), (0, N_pad - N))).astype(jnp.bfloat16)
    a_ve_p = jnp.swapaxes(a_ev_p, 0, 1)          # (N_pad, E_pad), streamed row tiles

    cparams = pltpu.CompilerParams(
        dimension_semantics=("parallel",),
        vmem_limit_bytes=32 * 1024 * 1024,
    )
    const = lambda i: (0, 0)
    rowtile = lambda i: (i, 0)

    # ---------------- phase 1: edges (node->edge gather + edge MLP) ----------
    edge_out_p = pl.pallas_call(
        edge_phase_kernel,
        out_shape=jax.ShapeDtypeStruct((E_pad, D), jnp.float32),
        grid=(E_pad // te,),
        in_specs=[
            pl.BlockSpec((te, N_pad), rowtile),      # a_ev tile      (bf16)
            pl.BlockSpec((te, D), rowtile),          # edge_rep tile  (bf16)
            pl.BlockSpec((N_pad, D), const),         # node_rep, resident (bf16)
            pl.BlockSpec((2 * D, H), const),         # W1 (BN folded, bf16)
            pl.BlockSpec((1, H), const),             # b1 (fp32)
            pl.BlockSpec((H, D), const),             # W2 (BN folded, bf16)
            pl.BlockSpec((1, D), const),             # b2 (fp32)
        ],
        out_specs=pl.BlockSpec((te, D), rowtile),
        compiler_params=cparams,
    )(a_ev_p, edge_rep_p, node_rep_p, e_w1, e_b1, e_w2, e_b2)

    # One XLA-side cast of the resident operand instead of a per-tile in-kernel cast.
    edge_out_bf16 = edge_out_p.astype(jnp.bfloat16)

    # ---------------- phase 2: nodes (edge->node gather + node MLP) ----------
    node_out_p = pl.pallas_call(
        node_phase_kernel,
        out_shape=jax.ShapeDtypeStruct((N_pad, D), jnp.float32),
        grid=(N_pad // tn,),
        in_specs=[
            pl.BlockSpec((tn, E_pad), rowtile),      # a_ve tile      (bf16)
            pl.BlockSpec((tn, D), rowtile),          # node_rep tile  (bf16)
            pl.BlockSpec((E_pad, D), const),         # edge_out, resident (bf16)
            pl.BlockSpec((2 * D, H), const),
            pl.BlockSpec((1, H), const),
            pl.BlockSpec((H, D), const),
            pl.BlockSpec((1, D), const),
        ],
        out_specs=pl.BlockSpec((tn, D), rowtile),
        compiler_params=cparams,
    )(a_ve_p, node_rep_p, edge_out_bf16, n_w1, n_b1, n_w2, n_b2)

    return node_out_p[:N], edge_out_p[:E]


# ----------------------------------------------------------- params / glue ---

def init_mlp_params(key, in_dim, hidden, out_dim):
    """get_mlp(in, hidden, out, 2) == Lin -> BN -> ReLU -> Lin -> BN -> ReLU."""
    k = jax.random.split(key, 12)
    w1 = jax.random.normal(k[0], (in_dim, hidden), jnp.float32) / jnp.sqrt(in_dim)
    b1 = 0.1 * jax.random.normal(k[1], (1, hidden), jnp.float32)
    bn1 = jnp.stack([
        1.0 + 0.1 * jax.random.normal(k[2], (hidden,), jnp.float32),           # gamma
        0.1 * jax.random.normal(k[3], (hidden,), jnp.float32),                 # beta
        0.1 * jax.random.normal(k[4], (hidden,), jnp.float32),                 # running mean
        1.0 + 0.1 * jnp.abs(jax.random.normal(k[5], (hidden,), jnp.float32)),  # running var
    ])
    w2 = jax.random.normal(k[6], (hidden, out_dim), jnp.float32) / jnp.sqrt(hidden)
    b2 = 0.1 * jax.random.normal(k[7], (1, out_dim), jnp.float32)
    bn2 = jnp.stack([
        1.0 + 0.1 * jax.random.normal(k[8], (out_dim,), jnp.float32),
        0.1 * jax.random.normal(k[9], (out_dim,), jnp.float32),
        0.1 * jax.random.normal(k[10], (out_dim,), jnp.float32),
        1.0 + 0.1 * jnp.abs(jax.random.normal(k[11], (out_dim,), jnp.float32)),
    ])
    return (w1, b1, bn1, w2, b2, bn2)


def reference_forward(node_rep, edge_rep, a_ev, edge_params, node_params):
    """Pure-JAX fp32 reference of the original module math (explicit BN)."""
    def mlp(x, p):
        w1, b1, bn1, w2, b2, bn2 = p
        h = x @ w1 + b1
        h = (h - bn1[2]) / jnp.sqrt(bn1[3] + _EPS) * bn1[0] + bn1[1]
        h = jnp.maximum(h, 0.0)
        o = h @ w2 + b2
        o = (o - bn2[2]) / jnp.sqrt(bn2[3] + _EPS) * bn2[0] + bn2[1]
        return jnp.maximum(o, 0.0)

    node2edge = a_ev @ node_rep
    edge_out = mlp(jnp.concatenate([edge_rep, node2edge], axis=-1), edge_params)
    edge2node = a_ev.T @ edge_out
    node_out = mlp(jnp.concatenate([node_rep, edge2node], axis=-1), node_params)
    return node_out, edge_out


# -------------------------------------------------------------------- main ---

if __name__ == "__main__":
    key = jax.random.PRNGKey(0)
    k_node, k_edge, k_mlp_e, k_mlp_n = jax.random.split(key, 4)

    rep_dim = 128                        # lane-dense feature dim (multiple of 128)
    hidden = rep_dim * _INNER_MLP_MULT   # 256
    N = 128                              # nodes

    # Deterministic small graph: ring of N nodes + N//2 chords -> E = 192 edges.
    src = list(range(N)) + list(range(0, N, 2))
    dst = [(i + 1) % N for i in range(N)] + [(i + 4) % N for i in range(0, N, 2)]
    E = len(src)
    src = jnp.asarray(src, jnp.int32)
    dst = jnp.asarray(dst, jnp.int32)

    a_ev = jnp.zeros((E, N), jnp.float32)
    a_ev = a_ev.at[jnp.arange(E), src].add(1.0)
    a_ev = a_ev.at[jnp.arange(E), dst].add(1.0)

    node_rep = jax.random.normal(k_node, (N, rep_dim), jnp.float32)
    edge_rep = jax.random.normal(k_edge, (E, rep_dim), jnp.float32)

    edge_params = init_mlp_params(k_mlp_e, 2 * rep_dim, hidden, rep_dim)
    node_params = init_mlp_params(k_mlp_n, 2 * rep_dim, hidden, rep_dim)

    node_out, edge_out = edge_node_forward(node_rep, edge_rep, a_ev,
                                           edge_params, node_params)
    jax.block_until_ready((node_out, edge_out))

    node_ref, edge_ref = reference_forward(node_rep, edge_rep, a_ev,
                                           edge_params, node_params)

    assert node_out.shape == (N, rep_dim) and edge_out.shape == (E, rep_dim)
    # bf16 MXU operands with fp32 accumulation -> loosened tolerance vs fp32 ref.
    assert jnp.allclose(edge_out, edge_ref, rtol=5e-2, atol=5e-2)
    assert jnp.allclose(node_out, node_ref, rtol=5e-2, atol=1e-1)

    print("KERNEL_OK")
</pallas_src>

<mosaic_0001>
module attributes {stable_mosaic.version = 11 : i64} {
  func.func @edge_phase_kernel(%arg0: i32, %arg1: memref<64x128xbf16, #tpu.memory_space<vmem>>, %arg2: memref<64x128xbf16, #tpu.memory_space<vmem>>, %arg3: memref<128x128xbf16, #tpu.memory_space<vmem>>, %arg4: memref<256x256xbf16, #tpu.memory_space<vmem>>, %arg5: memref<1x256xf32, #tpu.memory_space<vmem>>, %arg6: memref<256x128xbf16, #tpu.memory_space<vmem>>, %arg7: memref<1x128xf32, #tpu.memory_space<vmem>>, %arg8: memref<64x128xf32, #tpu.memory_space<vmem>>) attributes {dimension_semantics = [#tpu.dimension_semantics<parallel>], iteration_bounds = array<i64: 3>, scalar_prefetch = 0 : i64, scratch_operands = 0 : i64, tpu.core_type = #tpu.core_type<tc>, window_params = [{transform_indices = @transform_0, window_bounds = array<i64: 64, 128>}, {transform_indices = @transform_1, window_bounds = array<i64: 64, 128>}, {pipeline_mode = #tpu.pipeline_mode<synchronous>, transform_indices = @transform_2, window_bounds = array<i64: 128, 128>}, {pipeline_mode = #tpu.pipeline_mode<synchronous>, transform_indices = @transform_3, window_bounds = array<i64: 256, 256>}, {pipeline_mode = #tpu.pipeline_mode<synchronous>, transform_indices = @transform_4, window_bounds = array<i64: 1, 256>}, {pipeline_mode = #tpu.pipeline_mode<synchronous>, transform_indices = @transform_5, window_bounds = array<i64: 256, 128>}, {pipeline_mode = #tpu.pipeline_mode<synchronous>, transform_indices = @transform_6, window_bounds = array<i64: 1, 128>}, {transform_indices = @transform_7, window_bounds = array<i64: 64, 128>}]} {
    %c0 = arith.constant 0 : index
    %c0_0 = arith.constant 0 : index
    %0 = vector.load %arg1[%c0, %c0_0] : memref<64x128xbf16, #tpu.memory_space<vmem>>, vector<64x128xbf16>
    %c0_1 = arith.constant 0 : index
    %c0_2 = arith.constant 0 : index
    %1 = vector.load %arg3[%c0_1, %c0_2] : memref<128x128xbf16, #tpu.memory_space<vmem>>, vector<128x128xbf16>
    %cst = arith.constant dense<0.000000e+00> : vector<64x128xf32>
    %2 = tpu.matmul %0, %1, %cst {dimension_numbers = #tpu.dot_dimension_numbers<[1], [0], [0], [1], [0, 0, 1, 1], [], []>} : vector<64x128xbf16>, vector<128x128xbf16>, vector<64x128xf32> -> vector<64x128xf32>
    %c0_3 = arith.constant 0 : index
    %c0_4 = arith.constant 0 : index
    %3 = vector.load %arg2[%c0_3, %c0_4] : memref<64x128xbf16, #tpu.memory_space<vmem>>, vector<64x128xbf16>
    %4 = arith.truncf %2 : vector<64x128xf32> to vector<64x128xbf16>
    %5 = tpu.concatenate %3, %4 in 1 : vector<64x128xbf16>, vector<64x128xbf16> -> vector<64x256xbf16>
    %c0_5 = arith.constant 0 : index
    %c0_6 = arith.constant 0 : index
    %6 = vector.load %arg4[%c0_5, %c0_6] : memref<256x256xbf16, #tpu.memory_space<vmem>>, vector<256x256xbf16>
    %cst_7 = arith.constant dense<0.000000e+00> : vector<64x256xf32>
    %7 = tpu.matmul %5, %6, %cst_7 {dimension_numbers = #tpu.dot_dimension_numbers<[1], [0], [0], [1], [0, 0, 1, 1], [], []>} : vector<64x256xbf16>, vector<256x256xbf16>, vector<64x256xf32> -> vector<64x256xf32>
    %c0_8 = arith.constant 0 : index
    %c0_9 = arith.constant 0 : index
    %8 = vector.load %arg5[%c0_8, %c0_9] : memref<1x256xf32, #tpu.memory_space<vmem>>, vector<1x256xf32>
    %9 = vector.broadcast %8 : vector<1x256xf32> to vector<64x256xf32>
    %10 = arith.addf %7, %9 : vector<64x256xf32>
    %cst_10 = arith.constant 0.000000e+00 : f32
    %11 = vector.broadcast %cst_10 : f32 to vector<64x256xf32>
    %12 = arith.maximumf %10, %11 : vector<64x256xf32>
    %13 = arith.truncf %12 : vector<64x256xf32> to vector<64x256xbf16>
    %c0_11 = arith.constant 0 : index
    %c0_12 = arith.constant 0 : index
    %14 = vector.load %arg6[%c0_11, %c0_12] : memref<256x128xbf16, #tpu.memory_space<vmem>>, vector<256x128xbf16>
    %cst_13 = arith.constant dense<0.000000e+00> : vector<64x128xf32>
    %15 = tpu.matmul %13, %14, %cst_13 {dimension_numbers = #tpu.dot_dimension_numbers<[1], [0], [0], [1], [0, 0, 1, 1], [], []>} : vector<64x256xbf16>, vector<256x128xbf16>, vector<64x128xf32> -> vector<64x128xf32>
    %c0_14 = arith.constant 0 : index
    %c0_15 = arith.constant 0 : index
    %16 = vector.load %arg7[%c0_14, %c0_15] : memref<1x128xf32, #tpu.memory_space<vmem>>, vector<1x128xf32>
    %17 = vector.broadcast %16 : vector<1x128xf32> to vector<64x128xf32>
    %18 = arith.addf %15, %17 : vector<64x128xf32>
    %cst_16 = arith.constant 0.000000e+00 : f32
    %19 = vector.broadcast %cst_16 : f32 to vector<64x128xf32>
    %20 = arith.maximumf %18, %19 : vector<64x128xf32>
    %c0_17 = arith.constant 0 : index
    %c0_18 = arith.constant 0 : index
    %21 = vector.load %arg8[%c0_17, %c0_18] : memref<64x128xf32, #tpu.memory_space<vmem>>, vector<64x128xf32>
    tpu.vector_store %arg8[%c0_17, %c0_18], %20 {strides = array<i32>} : memref<64x128xf32, #tpu.memory_space<vmem>>, vector<64x128xf32>,
    return
  }
  func.func @transform_0(%arg0: i32) -> (i32, i32) {
    %c0_i32 = arith.constant 0 : i32
    %c0_i32_0 = arith.constant 0 : i32
    return %arg0, %c0_i32 : i32, i32
  }
  func.func @transform_1(%arg0: i32) -> (i32, i32) {
    %c0_i32 = arith.constant 0 : i32
    %c0_i32_0 = arith.constant 0 : i32
    return %arg0, %c0_i32 : i32, i32
  }
  func.func @transform_2(%arg0: i32) -> (i32, i32) {
    %c0_i32 = arith.constant 0 : i32
    %c0_i32_0 = arith.constant 0 : i32
    %c0_i32_1 = arith.constant 0 : i32
    return %c0_i32, %c0_i32_0 : i32, i32
  }
  func.func @transform_3(%arg0: i32) -> (i32, i32) {
    %c0_i32 = arith.constant 0 : i32
    %c0_i32_0 = arith.constant 0 : i32
    %c0_i32_1 = arith.constant 0 : i32
    return %c0_i32, %c0_i32_0 : i32, i32
  }
  func.func @transform_4(%arg0: i32) -> (i32, i32) {
    %c0_i32 = arith.constant 0 : i32
    %c0_i32_0 = arith.constant 0 : i32
    %c0_i32_1 = arith.constant 0 : i32
    return %c0_i32, %c0_i32_0 : i32, i32
  }
  func.func @transform_5(%arg0: i32) -> (i32, i32) {
    %c0_i32 = arith.constant 0 : i32
    %c0_i32_0 = arith.constant 0 : i32
    %c0_i32_1 = arith.constant 0 : i32
    return %c0_i32, %c0_i32_0 : i32, i32
  }
  func.func @transform_6(%arg0: i32) -> (i32, i32) {
    %c0_i32 = arith.constant 0 : i32
    %c0_i32_0 = arith.constant 0 : i32
    %c0_i32_1 = arith.constant 0 : i32
    return %c0_i32, %c0_i32_0 : i32, i32
  }
  func.func @transform_7(%arg0: i32) -> (i32, i32) {
    %c0_i32 = arith.constant 0 : i32
    %c0_i32_0 = arith.constant 0 : i32
    return %arg0, %c0_i32 : i32, i32
  }
}

</mosaic_0001>

<bundles_post_ra>
// kernel: tpu_custom_call.1
= control target key start
LH: loop header
LB: loop body
LE: loop exit
PB: predicated region body
PF: predicated region fallthrough
CT: control target
= control target key end

     0   :  { %s2180_s0 = inlined_call_operand.hbm [shape: bf16[192,128], index: 0, kind: input, shape index: {}]   ;;  %s2181_s1 = inlined_call_operand.hbm [shape: bf16[192,128], index: 1, kind: input, shape index: {}]   ;;  %s2182_s2 = inlined_call_operand.hbm [shape: bf16[128,128], index: 2, kind: input, shape index: {}]   ;;  %s2183_s3 = inlined_call_operand.hbm [shape: bf16[256,256], index: 3, kind: input, shape index: {}]   ;;  %s2184_s4 = inlined_call_operand.vmem [shape: f32[1,256], index: 4, kind: input, shape index: {}]   ;;  %s2185_s5 = inlined_call_operand.hbm [shape: bf16[256,128], index: 5, kind: input, shape index: {}]   ;;  %s2186_s6 = inlined_call_operand.vmem [shape: f32[1,128], index: 6, kind: input, shape index: {}]   ;;  %s2187_s7 = inlined_call_operand.hbm [shape: f32[192,128], index: 7, kind: output, shape index: {}]  }
   0x1   :  { %2197 = sst [smem:[#allocation20_spill]] %s2182_s2 }
   0x2   :  { %2198 = sst [smem:[#allocation21_spill]] %s2183_s3 }
   0x3   :  { %2199 = sst [smem:[#allocation22_spill]] %s2185_s5 }
   0x4   :  { %12 = vsyncpa [#allocation3], 0 }
   0x5   :  { %14 = vsyncpa [#allocation3 + $0x1], 0 }
   0x6   :  { %15 = vsyncpa [#allocation6], 0 }
   0x7   :  { %17 = vsyncpa [#allocation6 + $0x1], 0 }
   0x8   :  { %18 = vsyncpa [#allocation9], 0 }
   0x9   :  { %19 = vsyncpa [#allocation4], 0 }
   0xa   :  { %21 = vsyncpa [#allocation4 + $0x1], 0  ;;  %s1848_s24 = smov 0   ;;  %s1850_s25 = smov 0  }
   0xb   :  { %s1852_s26 = smov 0   ;;  %s1854_s27 = smov 0  }
   0xc LB: > { %2200 = sst [smem:[#allocation17_spill]] %s1790_s26  ;;  %s1869_s28 = sadd.s32 4294967295, %s1794_s27   ;;  %s1794_s27 = sphi %s1854_s27, %s2229_s27   ;;  %s1790_s26 = sphi %s1852_s26, %s2228_s26   ;;  %s1786_s25 = sphi %s1850_s25, %s2227_s25   ;;  %s1782_s24 = sphi %s1848_s24, %s2226_s24  }
   0xd   : > { %s1236_s29 = sadd.s32 4294967294, %s1794_s27   ;;  %p47_p0 = scmp.ne.s32.totalorder %s1786_s25, %s1782_s24 }
   0xe   : > { %p2188_p1 = scmp.eq.s32.totalorder %s1869_s28, 0  ;;  %p208_p3 = scmp.eq.s32.totalorder %s1236_s29, 2 }
   0xf   : > { %p1237_p5 = scmp.ge.s32.totalorder %s1794_s27, 1  ;;  %p215_p7 = scmp.lt.s32.totalorder %s1794_s27, 4 }
  0x10   : > { %p1878_p4 = por %p2188_p1, %p47_p0  ;;  %p1883_p6 = por %p208_p3, %p47_p0 }
  0x11   : > { %p1888_p8 = pnand %p1237_p5, %p215_p7  ;;  %s1796_s10 = smov [#allocation7]  }
  0x12   : > { %s2201_s30 = scalar_select %p1878_p4, 1, 0 }
  0x13   : > { %s2202_s8 = scalar_select %p1883_p6, 1, 0 }
  0x14   : > { %s2204_s9 = scalar_select %p1888_p8, 1, 0 }
  0x15   : > { %2203 = sst [smem:[#allocation18_spill]] %s2202_s8  ;;  %s227_s11 = sshll.u32 %s1796_s10, 4  ;;  %s228_s11 = int_to_ptr.vmem [resolvable:$true] %s227_s11 }
  0x16   : > { %p1422_p9 = pneg %p1888_p8  ;;  %s1797_s13 = smov [#allocation8]  }
  0x17   : > { %s240_s14 = sshll.u32 %s1797_s13, 4  ;;  %s2206_s2 = sld [smem:[#allocation20_spill]]  ;;  %s1900_s14 = int_to_ptr.vmem [resolvable:$true] %s240_s14 }
  0x18   : > { %p1896_p10 = pnand %p1422_p9, %p2188_p1 }
  0x1a   : > { %p1910_p12 = pneg %p1896_p10 }
  0x1d   : > { %s1572_s17 = scalar_lea.hbm %s2206_s2, 1024 }
  0x1e   : > { %p1573_p11 = scmp.ne.s32.totalorder %s2206_s2, %s1572_s17  ;;  %p1579_p3 = scmp.lt.u32.totalorder %s1572_s17, %s2206_s2 }
  0x20   : > { %p1575_p13 = pnand %p1910_p12, %p1573_p11 }
  0x22   : > { %p1576_p0 = pneg %p1575_p13 }
  0x24   : > { %p1581_p5 = pnand %p1579_p3, %p1576_p0 }
  0x26   : > { %1584 = shalt.err (!%p1581_p5)
}
  0x27   : > { %s1585_s23 = scalar_lea.vmem %s228_s11, 1024  ;;  %p1593_p2 = scmp.lt.s32.totalorder %s228_s11, %s228_s11 }
  0x28   : > { %p1586_p7 = scmp.ne.s32.totalorder %s228_s11, %s1585_s23  ;;  %p1594_p6 = scmp.lt.s32.totalorder %s1585_s23, %s1585_s23 }
  0x2a   : > { %p1588_p9 = pnand %p1586_p7, %p1910_p12  ;;  %p1595_p4 = por %p1594_p6, %p1593_p2 }
  0x2c   : > { %p1589_p1 = pneg %p1588_p9 }
  0x2e   : > { %p1596_p8 = pnand %p1595_p4, %p1589_p1 }
  0x30   : > { %1599 = shalt.err (!%p1596_p8)
}
  0x31   : > { %s2191_s29 = smov 64   ;;  %s2193_s10 = smov 4  }
  0x32   : > { %1425 = dma.hbm_to_vmem [thread:$0]  (!%p1896_p10), %s2206_s2, 1024, %s228_s11, [#allocation6], %s2191_s29, %s2191_s29, %s2193_s10  }
  0x33   : > { %s2208_s3 = sld [smem:[#allocation21_spill]] }
  0x39   : > { %s1600_s18 = scalar_lea.hbm %s2208_s3, 4096 }
  0x3a   : > { %p1601_p1 = scmp.ne.s32.totalorder %s2208_s3, %s1600_s18  ;;  %p1607_p6 = scmp.lt.u32.totalorder %s1600_s18, %s2208_s3 }
  0x3c   : > { %p1603_p2 = pnand %p1601_p1, %p1910_p12 }
  0x3e   : > { %p1604_p4 = pneg %p1603_p2 }
  0x40   : > { %p1609_p8 = pnand %p1607_p6, %p1604_p4 }
  0x42   : > { %1612 = shalt.err (!%p1609_p8)
}
  0x43   : > { %s1613_s11 = scalar_lea.vmem %s1900_s14, 4096  ;;  %p1621_p3 = scmp.lt.s32.totalorder %s1900_s14, %s1900_s14 }
  0x44   : > { %p1614_p11 = scmp.ne.s32.totalorder %s1900_s14, %s1613_s11  ;;  %p1622_p5 = scmp.lt.s32.totalorder %s1613_s11, %s1613_s11 }
  0x46   : > { %p1616_p13 = pnand %p1614_p11, %p1910_p12  ;;  %p1623_p7 = por %p1622_p5, %p1621_p3 }
  0x48   : > { %p1617_p0 = pneg %p1616_p13 }
  0x4a   : > { %p1624_p9 = pnand %p1623_p7, %p1617_p0 }
  0x4c   : > { %1627 = shalt.err (!%p1624_p9)
}
  0x4d   : > { %s1800_s13 = smov 128   ;;  %s1801_s15 = smov 8  }
  0x4e   : > { %1428 = dma.hbm_to_vmem [thread:$0]  (!%p1896_p10), %s2208_s3, 4096, %s1900_s14, [#allocation9], %s1800_s13, %s1800_s13, %s1801_s15  }
  0x4f   : > { %s1802_s18 = smov [#allocation10]   ;;  %s1953_s21 = sadd.s32 1, %s1794_s27  }
  0x50   : > { %s256_s19 = sshll.u32 %s1802_s18, 4  ;;  %s2209_s5 = sld [smem:[#allocation22_spill]]  ;;  %s257_s19 = int_to_ptr.vmem [resolvable:$true] %s256_s19 }
  0x56   : > { %s1628_s11 = scalar_lea.hbm %s2209_s5, 2048 }
  0x57   : > { %p1629_p1 = scmp.ne.s32.totalorder %s2209_s5, %s1628_s11  ;;  %p1635_p6 = scmp.lt.u32.totalorder %s1628_s11, %s2209_s5 }
  0x59   : > { %p1631_p2 = pnand %p1629_p1, %p1910_p12 }
  0x5b   : > { %p1632_p4 = pneg %p1631_p2 }
  0x5d   : > { %p1637_p8 = pnand %p1635_p6, %p1632_p4 }
  0x5f   : > { %1640 = shalt.err (!%p1637_p8)
}
  0x60   : > { %s1641_s14 = scalar_lea.vmem %s257_s19, 2048  ;;  %p1649_p3 = scmp.lt.s32.totalorder %s257_s19, %s257_s19 }
  0x61   : > { %p1642_p11 = scmp.ne.s32.totalorder %s257_s19, %s1641_s14  ;;  %p1650_p5 = scmp.lt.s32.totalorder %s1641_s14, %s1641_s14 }
  0x63   : > { %p1644_p13 = pnand %p1642_p11, %p1910_p12  ;;  %p1651_p7 = por %p1650_p5, %p1649_p3 }
  0x65   : > { %p1645_p0 = pneg %p1644_p13 }
  0x67   : > { %p1652_p9 = pnand %p1651_p7, %p1645_p0 }
  0x69   : > { %1655 = shalt.err (!%p1652_p9)
}
  0x6a   : > { %s2210_s29 = smov 4   ;;  %s2211_s10 = smov 64  }
  0x6b   : > { %1431 = dma.hbm_to_vmem [thread:$0]  (!%p1896_p10), %s2209_s5, 2048, %s257_s19, [#allocation9], %s2211_s10, %s2211_s10, %s2210_s29  }
  0x6c   : > { %s31_s20 = ssub.s32 %s1794_s27, %s1953_s21  ;;  %s34_s12 = sadd.s32 1, %s1790_s26 }
  0x6d   : > { %p32_p12 = scmp.eq.s32.totalorder %s31_s20, 0  ;;  %p41_p1 = scmp.ne.s32.totalorder %s1790_s26, %s1786_s25 }
  0x6e   : > { %p42_p2 = scmp.eq.s32.totalorder %s1794_s27, 0  ;;  %p1446_p4 = scmp.lt.s32.totalorder %s1794_s27, 3 }
  0x6f   : > { %s1984_s13 = scalar_select %p32_p12, %s1790_s26, %s34_s12  }
  0x70   : > { %p43_p6 = por %p42_p2, %p41_p1  ;;  %p2213_p8 = scmp.eq.s32.totalorder %s1869_s28, 2 }
  0x71   : > { %2212 = sst [smem:[#allocation19_spill]] %s1984_s13  ;;  %s273_s16 = sand.u32 1, %s1790_s26  }
  0x72   : > { %p1988_p11 = por %p2213_p8, %p41_p1  ;;  %s1325_s17 = sshll.u32 %s1794_s27, 9 }
  0x73   : > { %s1994_s18 = sshll.u32 %s273_s16, 5  ;;  %s1999_s23 = scalar_lea.hbm %s2180_s0, %s1325_s17 }
  0x74   : > { %s277_s11 = scalar_lea.vmem [#allocation2], %s1994_s18  ;;  %p2002_p10 = pnand %p1446_p4, %p43_p6 }
  0x75   : > { %s284_s14 = sshll.u32 %s277_s11, 4  ;;  %s2011_s12 = scalar_lea.hbm %s2181_s1, %s1325_s17  ;;  %s2006_s14 = int_to_ptr.vmem [resolvable:$true] %s284_s14 }
  0x76   : > { %s2013_s22 = scalar_lea.sflag [#allocation3], %s273_s16  ;;  %s1656_s19 = scalar_lea.hbm %s1999_s23, 512 }
  0x77   : > { %p1657_p13 = scmp.ne.s32.totalorder %s1999_s23, %s1656_s19  ;;  %p1658_p0 = pneg %p2002_p10 }
  0x78   : > { %s1661_s5 = scalar_lea.hbm %s2180_s0, 1536  ;;  %p1662_p7 = scmp.lt.u32.totalorder %s1999_s23, %s2180_s0 }
  0x79   : > { %p1659_p3 = pnand %p1658_p0, %p1657_p13  ;;  %p1663_p9 = scmp.lt.u32.totalorder %s1661_s5, %s1656_s19 }
  0x7a   : > { %p1665_p1 = scmp.lt.u32.totalorder %s1656_s19, %s1999_s23 }
  0x7b   : > { %p1660_p5 = pneg %p1659_p3  ;;  %p1664_p12 = por %p1663_p9, %p1662_p7 }
  0x7d   : > { %p1666_p2 = por %p1665_p1, %p1664_p12 }
  0x7f   : > { %p1667_p4 = pnand %p1666_p2, %p1660_p5 }
  0x81   : > { %1670 = shalt.err (!%p1667_p4)
}
  0x82   : > { %s1671_s16 = scalar_lea.vmem %s2006_s14, 512  ;;  %s1803_s3 = smov [#allocation2]  }
  0x83   : > { %p1672_p6 = scmp.ne.s32.totalorder %s2006_s14, %s1671_s16  ;;  %s1676_s17 = sshll.u32 %s1803_s3, 4  ;;  %s1677_s17 = int_to_ptr.vmem [resolvable:$false] %s1676_s17 }
  0x84   : > { %s1678_s26 = scalar_lea.vmem %s1677_s17, 1024  ;;  %p1679_p3 = scmp.lt.s32.totalorder %s2006_s14, %s1677_s17 }
  0x85   : > { %p1674_p8 = pnand %p1672_p6, %p1658_p0  ;;  %p1680_p7 = scmp.lt.s32.totalorder %s1678_s26, %s1671_s16 }
  0x87   : > { %p1675_p13 = pneg %p1674_p8  ;;  %p1681_p9 = por %p1680_p7, %p1679_p3 }
  0x89   : > { %p1682_p12 = pnand %p1681_p9, %p1675_p13 }
  0x8b   : > { %1685 = shalt.err (!%p1682_p12)
}
  0x8c   : > { %1435 = dma.hbm_to_vmem [thread:$0]  (!%p2002_p10), %s1999_s23, 512, %s2006_s14, %s2013_s22, %s2211_s10, %s2211_s10, %s2210_s29  }
  0x8d   : > { %s298_s5 = scalar_lea.vmem [#allocation5], %s1994_s18  ;;  %s294_s8 = sand.u32 1, %s1794_s27  }
  0x8e   : > { %s305_s13 = sshll.u32 %s298_s5, 4  ;;  %s2048_s20 = scalar_lea.sflag [#allocation6], %s294_s8  ;;  %s2046_s13 = int_to_ptr.vmem [resolvable:$true] %s305_s13 }
  0x8f   : > { %s1686_s19 = scalar_lea.hbm %s2011_s12, 512  ;;  %s1691_s3 = scalar_lea.hbm %s2181_s1, 1536 }
  0x90   : > { %p1687_p5 = scmp.ne.s32.totalorder %s2011_s12, %s1686_s19  ;;  %p1692_p4 = scmp.lt.u32.totalorder %s2011_s12, %s2181_s1 }
  0x91   : > { %p1693_p6 = scmp.lt.u32.totalorder %s1691_s3, %s1686_s19  ;;  %p1695_p13 = scmp.lt.u32.totalorder %s1686_s19, %s2011_s12 }
  0x92   : > { %p1689_p1 = pnand %p1687_p5, %p1658_p0 }
  0x93   : > { %p1694_p8 = por %p1693_p6, %p1692_p4 }
  0x94   : > { %p1690_p2 = pneg %p1689_p1 }
  0x95   : > { %p1696_p3 = por %p1695_p13, %p1694_p8 }
  0x97   : > { %p1697_p7 = pnand %p1696_p3, %p1690_p2 }
  0x99   : > { %1700 = shalt.err (!%p1697_p7)
}
  0x9a   : > { %s1701_s18 = scalar_lea.vmem %s2046_s13, 512  ;;  %s1804_s23 = smov [#allocation5]  }
  0x9b   : > { %p1702_p9 = scmp.ne.s32.totalorder %s2046_s13, %s1701_s18  ;;  %s1706_s14 = sshll.u32 %s1804_s23, 4  ;;  %s1707_s14 = int_to_ptr.vmem [resolvable:$false] %s1706_s14 }
  0x9c   : > { %s1708_s22 = scalar_lea.vmem %s1707_s14, 1024  ;;  %p1709_p1 = scmp.lt.s32.totalorder %s2046_s13, %s1707_s14 }
  0x9d   : > { %p1704_p12 = pnand %p1702_p9, %p1658_p0  ;;  %p1710_p4 = scmp.lt.s32.totalorder %s1708_s22, %s1701_s18 }
  0x9f   : > { %p1705_p5 = pneg %p1704_p12  ;;  %p1711_p6 = por %p1710_p4, %p1709_p1 }
  0xa1   : > { %p1712_p8 = pnand %p1711_p6, %p1705_p5 }
  0xa3   : > { %1715 = shalt.err (!%p1712_p8)
}
  0xa4   : > { %1438 = dma.hbm_to_vmem [thread:$0]  (!%p2002_p10), %s2011_s12, 512, %s2046_s13, %s2048_s20, %s2211_s10, %s2211_s10, %s2210_s29  }
  0xa5   : > { %p2216_p0 = scmp.ne.s32.totalorder %s2204_s9, 0 }
  0xa6   : > { %s2080_s5 = sand.u32 (!%p2216_p0), 1, %s1786_s25   ;;  %p2217_p2 = scmp.ne.s32.totalorder (!%p2216_p0), %s2201_s30, 0 }
  0xa7   : > { %317 = sbr.rel (%p2216_p0) target bundleno = 917 (0x395), region = 48  ;;  %s1249_s8 = sshll.u32 (!%p2216_p0), %s2080_s5, 5 }
  0xa8   : > { %s320_s19 = scalar_lea.sflag (!%p2216_p0), [#allocation3], %s2080_s5  ;;  %s2084_s11 = scalar_lea.vmem (!%p2216_p0), [#allocation2], %s1249_s8 }
  0xae   : > { %1761 = dma.done.wait (%p2217_p2), %s320_s19, 512  }
  0xaf   : > { %1763 = vsyncadd (%p2217_p2), %s320_s19, 4294966784  ;;  %s328_s29 = sand.u32 1, %s1869_s28   ;;  %s2091_s10 = scalar_lea.vmem [#allocation5], %s1249_s8 }
  0xb0   : > { %s329_s9 = scalar_lea.sflag [#allocation6], %s328_s29 }
  0xb1   : > { %1765 = dma.done.wait (%p2217_p2), %s329_s9, 512  }
  0xb2   : > { %1767 = vsyncadd (%p2217_p2), %s329_s9, 4294966784  ;;  %p2218_p10 = scmp.eq.s32.totalorder %s1869_s28, 0 }
  0xb4   : > { %1769 = dma.done.wait (%p2218_p10), [#allocation6], 1024   ;;  %p2219_p13 = pmov %p2218_p10 }
  0xb5   : > { %p2220_p3 = pmov %p2218_p10 }
  0xb6   : > { %1771 = vsyncadd (%p2219_p13), [#allocation6], 4294966272 }
  0xb7   : > { %1773 = dma.done.wait (%p2220_p3), [#allocation9], 6144   ;;  %p2221_p7 = pmov %p2220_p3 }
  0xb8   : > { %v1492_v0 = vld [vmem:[#allocation7] sm:$0xff]   ;;  %v1493_v1 = vld [vmem:[#allocation7 + $0x8] sm:$0xff]   ;;  %v1494_v2 = vld [vmem:[#allocation7 + $0x10] sm:$0xff]   ;;  %s1254_s20 = sshll.u32 %s2080_s5, 6  ;;  %s1327_s17 = sshll.u32 %s1869_s28, 10 }
  0xb9   : > { %1775 = vsyncadd (%p2221_p7), [#allocation9], 4294961152  ;;  %1380 = vmatprep.subr.bf16.mxu0 %v1492_v0  ;;  %v1495_v3 = vld [vmem:[#allocation7 + $0x18] sm:$0xff]   ;;  %v1500_v4 = vld [vmem:[%s2084_s11] sm:$0xff]   ;;  %s2120_s16 = scalar_lea.vmem [#allocation11], %s1254_s20  ;;  %s2135_s23 = scalar_lea.hbm %s2187_s7, %s1327_s17 }
  0xba   : > { %1381 = vmatpush3.bf16.msra.mxu0 %v1492_v0  ;;  %1396 = vmatprep.mubr.bf16.mxu0 %v1500_v4  ;;  %v1496_v5 = vld [vmem:[#allocation7 + $0x20] sm:$0xff]   ;;  %v1507_v8 = vld [vmem:[#allocation8 + $0x14] ss:$8 sps:$4 sm:$0xff]   ;;  %v1497_v9 = vld [vmem:[#allocation7 + $0x28] sm:$0xff]   ;;  %s1112_s3 = sshll.u32 %s2120_s16, 4  ;;  %s1099_s14 = scalar_lea.sflag [#allocation4], %s2080_s5  ;;  %s2130_s3 = int_to_ptr.vmem [resolvable:$true] %s1112_s3 }
  0xbb   : > { %1382 = vmatprep.subr.bf16.mxu0 %v1493_v1  ;;  %v1504_v6 = vld [vmem:[#allocation8 + $0x4] ss:$8 sps:$4 sm:$0xff]   ;;  %v1506_v7 = vld [vmem:[#allocation8] ss:$8 sps:$4 sm:$0xff]   ;;  %v1509_v10 = vld [vmem:[#allocation8 + $0x10] ss:$8 sps:$4 sm:$0xff]  }
  0xbc   : > { %785 = vmatprep.subr.bf16.mxu1 %v1504_v6  ;;  %v1510_v11 = vld [vmem:[#allocation8 + $0x24] ss:$8 sps:$4 sm:$0xff]   ;;  %v1498_v12 = vld [vmem:[#allocation7 + $0x30] sm:$0xff]   ;;  %v1512_v13 = vld [vmem:[#allocation8 + $0x20] ss:$8 sps:$4 sm:$0xff]   ;;  %s1716_s22 = scalar_lea.vmem %s2130_s3, 1024 }
  0xbd   : > { %786 = vmatpush1.bf16.msra.mxu1 %v1506_v7  ;;  %v1513_v14 = vld [vmem:[#allocation8 + $0x34] ss:$8 sps:$4 sm:$0xff]   ;;  %v1515_v16 = vld [vmem:[#allocation8 + $0x30] ss:$8 sps:$4 sm:$0xff]   ;;  %v1516_v17 = vld [vmem:[#allocation8 + $0x44] ss:$8 sps:$4 sm:$0xff]   ;;  %p1717_p9 = scmp.ne.s32.totalorder %s2130_s3, %s1716_s22 }
  0xbe   : > { %1383 = vmatpush3.bf16.msra.mxu0 %v1493_v1  ;;  %787 = vmatprep.subr.bf16.mxu1 %v1507_v8  ;;  %v1499_v15 = vld [vmem:[#allocation7 + $0x38] sm:$0xff]   ;;  %v1518_v18 = vld [vmem:[#allocation8 + $0x40] ss:$8 sps:$4 sm:$0xff]   ;;  %v1502_v21 = vld [vmem:[%s2084_s11 + $0x10] sm:$0xff]   ;;  %s1805_s28 = smov [#allocation11]  }
  0xbf   : > { %1384 = vmatprep.subr.bf16.mxu0 %v1494_v2  ;;  %v1519_v19 = vld [vmem:[#allocation8 + $0x54] ss:$8 sps:$4 sm:$0xff]   ;;  %v1501_v20 = vld [vmem:[%s2084_s11 + $0x8] sm:$0xff]   ;;  %v1521_v22 = vld [vmem:[#allocation8 + $0x50] ss:$8 sps:$4 sm:$0xff]   ;;  %p1718_p12 = pnand %p1717_p9, %p1988_p11  ;;  %s1720_s8 = sshll.u32 %s1805_s28, 4  ;;  %s1721_s8 = int_to_ptr.vmem [resolvable:$false] %s1720_s8 }
  0xc0   : > { %v1522_v23 = vld [vmem:[#allocation8 + $0x64] ss:$8 sps:$4 sm:$0xff]   ;;  %v1524_v24 = vld [vmem:[#allocation8 + $0x60] ss:$8 sps:$4 sm:$0xff]   ;;  %v1525_v25 = vld [vmem:[#allocation8 + $0x74] ss:$8 sps:$4 sm:$0xff]   ;;  %p1723_p1 = scmp.lt.s32.totalorder %s2130_s3, %s1721_s8 }
  0xc1   : > { %788 = vmatpush1.bf16.msra.mxu1 %v1509_v10  ;;  %v1503_v26 = vld [vmem:[%s2084_s11 + $0x18] sm:$0xff]   ;;  %v1528_v28 = vld [vmem:[#allocation8 + $0x84] ss:$8 sps:$4 sm:$0xff]   ;;  %v1530_v29 = vld [vmem:[#allocation8 + $0x80] ss:$8 sps:$4 sm:$0xff]   ;;  %p1719_p5 = pneg %p1718_p12  ;;  %s1722_s19 = scalar_lea.vmem %s1721_s8, 2048 }
  0xc2   : > { %1385 = vmatpush3.bf16.msra.mxu0 %v1494_v2  ;;  %789 = vmatprep.subr.bf16.mxu1 %v1510_v11  ;;  %v1527_v27 = vld [vmem:[#allocation8 + $0x70] ss:$8 sps:$4 sm:$0xff]   ;;  %v1531_v30 = vld [vmem:[#allocation8 + $0x94] ss:$8 sps:$4 sm:$0xff]   ;;  %v1534_v32 = vld [vmem:[#allocation8 + $0xa4] ss:$8 sps:$4 sm:$0xff]   ;;  %p1724_p4 = scmp.lt.s32.totalorder %s1722_s19, %s1716_s22 }
  0xc3   : > { %1386 = vmatprep.subr.bf16.mxu0 %v1495_v3  ;;  %v1533_v31 = vld [vmem:[#allocation8 + $0x90] ss:$8 sps:$4 sm:$0xff]   ;;  %v1536_v33 = vld [vmem:[#allocation8 + $0xa0] ss:$8 sps:$4 sm:$0xff]   ;;  %v1537_v34 = vld [vmem:[#allocation8 + $0xb4] ss:$8 sps:$4 sm:$0xff]  }
  0xc4   : > { %v1539_v35 = vld [vmem:[#allocation8 + $0xb0] ss:$8 sps:$4 sm:$0xff]   ;;  %v1540_v36 = vld [vmem:[#allocation8 + $0xc4] ss:$8 sps:$4 sm:$0xff]   ;;  %v1542_v37 = vld [vmem:[#allocation8 + $0xc0] ss:$8 sps:$4 sm:$0xff]   ;;  %p1725_p6 = por %p1724_p4, %p1723_p1 }
  0xc5   : > { %790 = vmatpush1.bf16.msra.mxu1 %v1512_v13  ;;  %v1543_v38 = vld [vmem:[#allocation8 + $0xd4] ss:$8 sps:$4 sm:$0xff]   ;;  %v1545_v39 = vld [vmem:[#allocation8 + $0xd0] ss:$8 sps:$4 sm:$0xff]   ;;  %v1546_v40 = vld [vmem:[#allocation8 + $0xe4] ss:$8 sps:$4 sm:$0xff]  }
  0xc6   : > { %1387 = vmatpush3.bf16.msra.mxu0 %v1495_v3  ;;  %791 = vmatprep.subr.bf16.mxu1 %v1513_v14  ;;  %v1548_v41 = vld [vmem:[#allocation8 + $0xe0] ss:$8 sps:$4 sm:$0xff]   ;;  %v1549_v42 = vld [vmem:[#allocation8 + $0xf4] ss:$8 sps:$4 sm:$0xff]   ;;  %v1551_v43 = vld [vmem:[#allocation8 + $0xf0] ss:$8 sps:$4 sm:$0xff]   ;;  %p1726_p8 = pnand %p1725_p6, %p1719_p5 }
  0xc7   : > { %1388 = vmatprep.subr.bf16.mxu0 %v1496_v5  ;;  %v1556_v44 = vld [vmem:[#allocation10 + $0x40] sm:$0xff]   ;;  %v1558_v46 = vld [vmem:[#allocation10 + $0x48] sm:$0xff]   ;;  %v1560_v48 = vld [vmem:[#allocation10 + $0x50] sm:$0xff]  }
  0xc8   : > { %v1557_v45 = vld [vmem:[#allocation10] sm:$0xff]   ;;  %v1559_v47 = vld [vmem:[#allocation10 + $0x8] sm:$0xff]   ;;  %v1561_v49 = vld [vmem:[#allocation10 + $0x10] sm:$0xff]  }
  0xc9   : > { %792 = vmatpush1.bf16.msra.mxu1 %v1515_v16  ;;  %v1562_v50 = vld [vmem:[#allocation10 + $0x58] sm:$0xff]   ;;  %v1564_v52 = vld [vmem:[#allocation10 + $0x60] sm:$0xff]   ;;  %v1566_v54 = vld [vmem:[#allocation10 + $0x68] sm:$0xff]  }
  0xca   : > { %1389 = vmatpush3.bf16.msra.mxu0 %v1496_v5  ;;  %793 = vmatprep.subr.bf16.mxu1 %v1516_v17  ;;  %v1563_v51 = vld [vmem:[#allocation10 + $0x18] sm:$0xff]   ;;  %v1565_v53 = vld [vmem:[#allocation10 + $0x20] sm:$0xff]   ;;  %v1553_v2 = vld [vmem:[%s2091_s10 + $0x8] sm:$0xff]  }
  0xcb   : > { %1390 = vmatprep.subr.bf16.mxu0 %v1497_v9  ;;  %v1552_v60 = vld [vmem:[%s2091_s10] sm:$0xff]   ;;  %v1554_v5 = vld [vmem:[%s2091_s10 + $0x10] sm:$0xff]   ;;  %v1555_v6 = vld [vmem:[%s2091_s10 + $0x18] sm:$0xff]  }
  0xcc   : > { %v1567_v7 = vld [vmem:[#allocation10 + $0x28] sm:$0xff]   ;;  %v1568_v8 = vld [vmem:[#allocation10 + $0x70] sm:$0xff]   ;;  %v1570_v10 = vld [vmem:[#allocation10 + $0x78] sm:$0xff]  }
  0xcd   : > { %794 = vmatpush1.bf16.msra.mxu1 %v1518_v18  ;;  %v1571_v11 = vld [vmem:[#allocation10 + $0x38] sm:$0xff]  }
  0xce   : > { %1391 = vmatpush3.bf16.msra.mxu0 %v1497_v9  ;;  %795 = vmatprep.subr.bf16.mxu1 %v1519_v19  ;;  %v1569_v9 = vld [vmem:[#allocation10 + $0x30] sm:$0xff]  }
  0xcf   : > { %1392 = vmatprep.subr.bf16.mxu0 %v1498_v12 }
  0xd1   : > { %796 = vmatpush1.bf16.msra.mxu1 %v1521_v22 }
  0xd2   : > { %1393 = vmatpush3.bf16.msra.mxu0 %v1498_v12  ;;  %797 = vmatprep.subr.bf16.mxu1 %v1522_v23  ;;  %v615_v12 = vlaneseq }
  0xd3   : > { %1394 = vmatprep.subr.bf16.mxu0 %v1499_v15 }
  0xd4   : > { %v616_v13 = vshrl.u32 %v615_v12, 7  ;;  %v1303_v12 = vld [vmem:[%s2186_s6] ss:$0 sm:$0xff] }
  0xd5   : > { %798 = vmatpush1.bf16.msra.mxu1 %v1524_v24 }
  0xd6   : > { %1395 = vmatpush3.bf16.msra.mxu0 %v1499_v15  ;;  %799 = vmatprep.subr.bf16.mxu1 %v1525_v25  ;;  %v617_v14 = vsub.s32 0, %v616_v13  ;;  %v613_v15 = vld [vmem:[%s2184_s4] sm:$0x3]  ;;  %v621_v16 = vsub.s32 1, %v616_v13 }
  0xd7   : > { %1340 = vmatprep.subr.bf16.mxu0 %v1556_v44 }
  0xd8   : > { %v618_v17 = vrot.slane %v613_v15, %v617_v14  ;;  %v622_v18 = vrot.slane %v613_v15, %v621_v16 }
  0xd9   : > { %1397 = vmatmul.mubr.bf16.vlgmr.msra.gmra.mrb[0].mxu0 %v1501_v20  ;;  %800 = vmatpush1.bf16.msra.mxu1 %v1527_v27 }
  0xda   : > { %1400 = vmatprep.mubr.bf16.mxu0 %v1502_v21  ;;  %801 = vmatprep.subr.bf16.mxu1 %v1528_v28 }
  0xdb   : > { %1341 = vmatpush3.bf16.msra.mxu0 %v1557_v45 }
  0xdc   : > { %1342 = vmatprep.subr.bf16.mxu0 %v1558_v46 }
  0xdd   : > { %802 = vmatpush1.bf16.msra.mxu1 %v1530_v29 }
  0xde   : > { %803 = vmatprep.subr.bf16.mxu1 %v1531_v30 }
  0xdf   : > { %1343 = vmatpush3.bf16.msra.mxu0 %v1559_v47 }
  0xe0   : > { %1344 = vmatprep.subr.bf16.mxu0 %v1560_v48 }
  0xe1   : > { %1401 = vmatmul.mubr.bf16.gmra.mrb[4].mxu0 %v1503_v26  ;;  %804 = vmatpush1.bf16.msra.mxu1 %v1533_v31 }
  0xe2   : > { %805 = vmatprep.subr.bf16.mxu1 %v1534_v32 }
  0xe3   : > { %1345 = vmatpush3.bf16.msra.mxu0 %v1561_v49 }
  0xe4   : > { %1346 = vmatprep.subr.bf16.mxu0 %v1562_v50 }
  0xe5   : > { %806 = vmatpush1.bf16.msra.mxu1 %v1536_v33 }
  0xe6   : > { %807 = vmatprep.subr.bf16.mxu1 %v1537_v34 }
  0xe7   : > { %1347 = vmatpush3.bf16.msra.mxu0 %v1563_v51 }
  0xe8   : > { %1348 = vmatprep.subr.bf16.mxu0 %v1564_v52 }
  0xe9   : > { %808 = vmatpush1.bf16.msra.mxu1 %v1539_v35 }
  0xea   : > { %809 = vmatprep.subr.bf16.mxu1 %v1540_v36 }
  0xeb   : > { %1349 = vmatpush3.bf16.msra.mxu0 %v1565_v53 }
  0xec   : > { %1350 = vmatprep.subr.bf16.mxu0 %v1566_v54 }
  0xed   : > { %810 = vmatpush1.bf16.msra.mxu1 %v1542_v37 }
  0xee   : > { %811 = vmatprep.subr.bf16.mxu1 %v1543_v38 }
  0xef   : > { %1351 = vmatpush3.bf16.msra.mxu0 %v1567_v7 }
  0xf0   : > { %1352 = vmatprep.subr.bf16.mxu0 %v1568_v8 }
  0xf1   : > { %812 = vmatpush1.bf16.msra.mxu1 %v1545_v39 }
  0xf2   : > { %813 = vmatprep.subr.bf16.mxu1 %v1546_v40 }
  0xf3   : > { %1353 = vmatpush3.bf16.msra.mxu0 %v1569_v9 }
  0xf4   : > { %1354 = vmatprep.subr.bf16.mxu0 %v1570_v10 }
  0xf5   : > { %814 = vmatpush1.bf16.msra.mxu1 %v1548_v41 }
  0xf6   : > { %815 = vmatprep.subr.bf16.mxu1 %v1549_v42 }
  0xf7   : > { %1355 = vmatpush3.bf16.msra.mxu0 %v1571_v11 }
  0xf9   : > { %816 = vmatpush1.bf16.msra.mxu1 %v1551_v43 }
 0x1ac   : > { %v1398_v55 = vpop.f32.mrb[0].mxu0 }
 0x1ad   : > { %v514_v56 = vpop.f32.mrb[1].mxu0 }
 0x1ae   : > { %v1399_v57 = vpop.f32.mrb[2].mxu0 }
 0x1af   : > { %v554_v58 = vpack.c.bf16 %v1399_v57, %v1398_v55  ;;  %v517_v59 = vpop.f32.mrb[3].mxu0 }
 0x1b0   : > { %v553_v61 = vpack.c.bf16 %v517_v59, %v514_v56 }
 0x1b2   : > { %817 = vmatprep.mubr.bf16.mxu1 %v553_v61 }
 0x1b3   : > { %818 = vmatmul.mubr.bf16.vlgmr.msra.gmra.mrb[0].mxu1 %v1552_v60 }
 0x1b4   : > { %827 = vmatprep.mubr.bf16.mxu1 %v554_v58  ;;  %v1402_v62 = vpop.f32.mrb[4].mxu0 }
 0x1b5   : > { %v530_v63 = vpop.f32.mrb[5].mxu0 }
 0x1b6   : > { %v1403_v0 = vpop.f32.mrb[6].mxu0 }
 0x1b7   : > { %v556_v1 = vpack.c.bf16 %v1403_v0, %v1402_v62  ;;  %v533_v3 = vpop.f32.mrb[7].mxu0 }
 0x1b8   : > { %v555_v4 = vpack.c.bf16 %v533_v3, %v530_v63 }
 0x1bb   : > { %828 = vmatmul.mubr.bf16.gmra.mrb[4].mxu1 %v1553_v2 }
 0x1bc   : > { %837 = vmatprep.mubr.bf16.mxu1 %v555_v4 }
 0x1c3   : > { %838 = vmatmul.mubr.bf16.gmra.mrb[8].mxu1 %v1554_v5 }
 0x1c4   : > { %847 = vmatprep.mubr.bf16.mxu1 %v556_v1 }
 0x1cb   : > { %848 = vmatmul.mubr.bf16.gmra.mrb[12].mxu1 %v1555_v6 }
 0x286   : > { %v819_v19 = vpop.f32.mrb[0].mxu1 }
 0x287   : > { %v820_v20 = vadd.f32 %v819_v19, %v618_v17  ;;  %v821_v21 = vpop.f32.mrb[1].mxu1 }
 0x288   : > { %v822_v22 = vadd.f32 %v821_v21, %v622_v18  ;;  %v823_v23 = vpop.f32.mrb[2].mxu1 }
 0x289   : > { %v824_v24 = vadd.f32 %v823_v23, %v618_v17  ;;  %v825_v25 = vpop.f32.mrb[3].mxu1  ;;  %v858_v27 = vmax.f32 %v820_v20, 0.0 }
 0x28a   : > { %v826_v26 = vadd.f32 %v825_v25, %v622_v18  ;;  %v859_v29 = vmax.f32 %v822_v22, 0.0 }
 0x28b   : > { %v860_v28 = vmax.f32 %v824_v24, 0.0 }
 0x28c   : > { %v861_v30 = vmax.f32 %v826_v26, 0.0 }
 0x28d   : > { %v874_v31 = vpack.c.bf16 %v860_v28, %v858_v27 }
 0x28e   : > { %v875_v32 = vpack.c.bf16 %v861_v30, %v859_v29  ;;  %v829_v33 = vpop.f32.mrb[4].mxu1 }
 0x28f   : > { %v830_v34 = vadd.f32 %v829_v33, %v618_v17  ;;  %v831_v35 = vpop.f32.mrb[5].mxu1 }
 0x290   : > { %v832_v36 = vadd.f32 %v831_v35, %v622_v18  ;;  %v833_v37 = vpop.f32.mrb[6].mxu1  ;;  %1049 = vmatprep.mubr.bf16.mxu0 %v875_v32 }
 0x291   : > { %v834_v38 = vadd.f32 %v833_v37, %v618_v17  ;;  %v835_v39 = vpop.f32.mrb[7].mxu1  ;;  %1050 = vmatmul.mubr.bf16.vlgmr.msra.gmra.mrb[8].mxu0 %v874_v31  ;;  %v862_v41 = vmax.f32 %v830_v34, 0.0 }
 0x292   : > { %v836_v40 = vadd.f32 %v835_v39, %v622_v18  ;;  %v863_v43 = vmax.f32 %v832_v36, 0.0 }
 0x293   : > { %v864_v42 = vmax.f32 %v834_v38, 0.0 }
 0x294   : > { %v865_v44 = vmax.f32 %v836_v40, 0.0 }
 0x295   : > { %v876_v45 = vpack.c.bf16 %v864_v42, %v862_v41 }
 0x296   : > { %v877_v46 = vpack.c.bf16 %v865_v44, %v863_v43  ;;  %v839_v47 = vpop.f32.mrb[8].mxu1 }
 0x297   : > { %v840_v48 = vadd.f32 %v839_v47, %v618_v17  ;;  %v841_v49 = vpop.f32.mrb[9].mxu1 }
 0x298   : > { %v842_v50 = vadd.f32 %v841_v49, %v622_v18  ;;  %v843_v51 = vpop.f32.mrb[10].mxu1  ;;  %1057 = vmatprep.mubr.bf16.mxu0 %v877_v46 }
 0x299   : > { %v844_v52 = vadd.f32 %v843_v51, %v618_v17  ;;  %v845_v53 = vpop.f32.mrb[11].mxu1  ;;  %1058 = vmatmul.mubr.bf16.gmra.mrb[12].mxu0 %v876_v45  ;;  %v866_v55 = vmax.f32 %v840_v48, 0.0 }
 0x29a   : > { %v846_v54 = vadd.f32 %v845_v53, %v622_v18  ;;  %v867_v57 = vmax.f32 %v842_v50, 0.0 }
 0x29b   : > { %v868_v56 = vmax.f32 %v844_v52, 0.0 }
 0x29c   : > { %v869_v58 = vmax.f32 %v846_v54, 0.0 }
 0x29d   : > { %v878_v59 = vpack.c.bf16 %v868_v56, %v866_v55 }
 0x29e   : > { %v879_v60 = vpack.c.bf16 %v869_v58, %v867_v57  ;;  %v849_v61 = vpop.f32.mrb[12].mxu1 }
 0x29f   : > { %v850_v62 = vadd.f32 %v849_v61, %v618_v17  ;;  %v851_v63 = vpop.f32.mrb[13].mxu1 }
 0x2a0   : > { %v852_v0 = vadd.f32 %v851_v63, %v622_v18  ;;  %v853_v1 = vpop.f32.mrb[14].mxu1  ;;  %1065 = vmatprep.mubr.bf16.mxu0 %v879_v60 }
 0x2a1   : > { %v854_v2 = vadd.f32 %v853_v1, %v618_v17  ;;  %v855_v3 = vpop.f32.mrb[15].mxu1  ;;  %1066 = vmatmul.mubr.bf16.gmra.mrb[16].mxu0 %v878_v59  ;;  %v870_v5 = vmax.f32 %v850_v62, 0.0 }
 0x2a2   : > { %v856_v4 = vadd.f32 %v855_v3, %v622_v18  ;;  %v871_v7 = vmax.f32 %v852_v0, 0.0 }
 0x2a3   : > { %v872_v6 = vmax.f32 %v854_v2, 0.0 }
 0x2a4   : > { %v873_v8 = vmax.f32 %v856_v4, 0.0 }
 0x2a5   : > { %v880_v9 = vpack.c.bf16 %v872_v6, %v870_v5 }
 0x2a6   : > { %v881_v10 = vpack.c.bf16 %v873_v8, %v871_v7 }
 0x2a8   : > { %1073 = vmatprep.mubr.bf16.mxu0 %v881_v10 }
 0x2a9   : > { %1074 = vmatmul.mubr.bf16.gmra.mrb[20].mxu0 %v880_v9 }
 0x364   : > { %v1356_v11 = vpop.f32.mrb[8].mxu0 }
 0x365   : > { %v1357_v13 = vpop.f32.mrb[9].mxu0 }
 0x366   : > { %v1358_v14 = vadd.f32 %v1357_v13, %v1356_v11  ;;  %v1359_v15 = vpop.f32.mrb[10].mxu0 }
 0x367   : > { %v1360_v16 = vpop.f32.mrb[11].mxu0 }
 0x368   : > { %v1052_v17 = vadd.f32 %v1358_v14, %v1303_v12  ;;  %v1361_v18 = vadd.f32 %v1360_v16, %v1359_v15 }
 0x36a   : > { %v1082_v19 = vmax.f32 %v1052_v17, 0.0  ;;  %v1055_v20 = vadd.f32 %v1361_v18, %v1303_v12 }
 0x36c   : > { %1090 = vst [vmem:[%s2120_s16] sm:$0xff] %v1082_v19  ;;  %v1083_v21 = vmax.f32 %v1055_v20, 0.0  ;;  %v1362_v22 = vpop.f32.mrb[12].mxu0 }
 0x36d   : > { %v1363_v23 = vpop.f32.mrb[13].mxu0 }
 0x36e   : > { %1091 = vst [vmem:[%s2120_s16 + $0x8] sm:$0xff] %v1083_v21  ;;  %v1364_v24 = vadd.f32 %v1363_v23, %v1362_v22  ;;  %v1365_v25 = vpop.f32.mrb[14].mxu0 }
 0x36f   : > { %v1366_v26 = vpop.f32.mrb[15].mxu0 }
 0x370   : > { %v1060_v27 = vadd.f32 %v1364_v24, %v1303_v12  ;;  %v1367_v28 = vadd.f32 %v1366_v26, %v1365_v25 }
 0x372   : > { %v1084_v29 = vmax.f32 %v1060_v27, 0.0  ;;  %v1063_v30 = vadd.f32 %v1367_v28, %v1303_v12 }
 0x374   : > { %1092 = vst [vmem:[%s2120_s16 + $0x10] sm:$0xff] %v1084_v29  ;;  %v1085_v31 = vmax.f32 %v1063_v30, 0.0  ;;  %v1368_v32 = vpop.f32.mrb[16].mxu0 }
 0x375   : > { %v1369_v33 = vpop.f32.mrb[17].mxu0 }
 0x376   : > { %1093 = vst [vmem:[%s2120_s16 + $0x18] sm:$0xff] %v1085_v31  ;;  %v1370_v34 = vadd.f32 %v1369_v33, %v1368_v32  ;;  %v1371_v35 = vpop.f32.mrb[18].mxu0 }
 0x377   : > { %v1372_v36 = vpop.f32.mrb[19].mxu0 }
 0x378   : > { %v1068_v37 = vadd.f32 %v1370_v34, %v1303_v12  ;;  %v1373_v38 = vadd.f32 %v1372_v36, %v1371_v35 }
 0x37a   : > { %v1086_v39 = vmax.f32 %v1068_v37, 0.0  ;;  %v1071_v40 = vadd.f32 %v1373_v38, %v1303_v12 }
 0x37c   : > { %1094 = vst [vmem:[%s2120_s16 + $0x20] sm:$0xff] %v1086_v39  ;;  %v1087_v41 = vmax.f32 %v1071_v40, 0.0  ;;  %v1374_v42 = vpop.f32.mrb[20].mxu0 }
 0x37d   : > { %v1375_v43 = vpop.f32.mrb[21].mxu0 }
 0x37e   : > { %1095 = vst [vmem:[%s2120_s16 + $0x28] sm:$0xff] %v1087_v41  ;;  %v1376_v44 = vadd.f32 %v1375_v43, %v1374_v42  ;;  %v1377_v45 = vpop.f32.mrb[22].mxu0 }
 0x37f   : > { %v1378_v46 = vpop.f32.mrb[23].mxu0 }
 0x380   : > { %v1076_v47 = vadd.f32 %v1376_v44, %v1303_v12  ;;  %v1379_v48 = vadd.f32 %v1378_v46, %v1377_v45 }
 0x382   : > { %v1088_v49 = vmax.f32 %v1076_v47, 0.0  ;;  %v1079_v50 = vadd.f32 %v1379_v48, %v1303_v12 }
 0x384   : > { %1096 = vst [vmem:[%s2120_s16 + $0x30] sm:$0xff] %v1088_v49  ;;  %v1089_v51 = vmax.f32 %v1079_v50, 0.0 }
 0x386   : > { %1097 = vst [vmem:[%s2120_s16 + $0x38] sm:$0xff] %v1089_v51 }
 0x387   : > { %1729 = shalt.err (!%p1726_p8)
}
 0x388   : > { %s1730_s11 = scalar_lea.hbm %s2135_s23, 1024  ;;  %s1734_s10 = scalar_lea.hbm %s2187_s7, 3072 }
 0x389   : > { %p1731_p0 = scmp.ne.s32.totalorder %s2135_s23, %s1730_s11  ;;  %p1735_p13 = scmp.lt.u32.totalorder %s2135_s23, %s2187_s7 }
 0x38a   : > { %p1736_p3 = scmp.lt.u32.totalorder %s1734_s10, %s1730_s11  ;;  %p1738_p9 = scmp.lt.u32.totalorder %s1730_s11, %s2135_s23 }
 0x38b   : > { %p1732_p2 = pnand %p1731_p0, %p1988_p11 }
 0x38c   : > { %p1737_p7 = por %p1736_p3, %p1735_p13 }
 0x38d   : > { %p1733_p10 = pneg %p1732_p2 }
 0x38e   : > { %p1739_p12 = por %p1738_p9, %p1737_p7 }
 0x390   : > { %p1740_p5 = pnand %p1739_p12, %p1733_p10 }
 0x392   : > { %1743 = shalt.err (!%p1740_p5)
}
 0x393   : > { %s1806_s12 = smov 128   ;;  %s1807_s13 = smov 8  }
 0x394   : > { %1420 = dma.vmem_to_hbm [thread:$0]  (%p1988_p11), %s2130_s3, 1024, %s2135_s23, %s1099_s14, %s1806_s12, %s1806_s12, %s1807_s13  }
 0x395 PF: > { %s2222_s20 = sld [smem:[#allocation18_spill]]  ;;  %p1450_p1 = scmp.ge.s32.totalorder %s1794_s27, 2 }
 0x396   : > { %s1127_s16 = sand.u32 1, %s1782_s24  }
 0x397   : > { %s1128_s17 = scalar_lea.sflag [#allocation4], %s1127_s16 }
 0x39b   : > { %p2223_p4 = scmp.ne.s32.totalorder %s2222_s20, 0 }
 0x39d   : > { %p1440_p6 = pnand %p1450_p1, %p2223_p4 }
 0x39f   : > { %1777 = dma.done.wait (!%p1440_p6), %s1128_s17, 1024  }
 0x3a0   : > { %1779 = vsyncadd (!%p1440_p6), %s1128_s17, 4294966272  ;;  %s2224_s26 = sld [smem:[#allocation17_spill]]  ;;  %s2225_s18 = sld [smem:[#allocation19_spill]] }
 0x3a1   : > { %p24_p8 = scmp.ge.s32.totalorder %s1953_s21, 5   ;;  %s2226_s24 = smov %s1786_s25 }
 0x3a2   : > { %s2229_s27 = smov %s1953_s21 }
 0x3a3   :  { %26 = sbr.rel (!%p24_p8) target bundleno = 12 (0xc), region = 118 }
 0x3a6   : > { %s2227_s25 = smov %s2224_s26  ;;  %s2228_s26 = smov %s2225_s18 }
 0x3aa   :  { %1133 = vsyncpa [#allocation3], 1 }
 0x3ab   :  { %1135 = vsyncpa [#allocation3 + $0x1], 1 }
 0x3ac   :  { %1136 = vsyncpa [#allocation6], 1 }
 0x3ad   :  { %1138 = vsyncpa [#allocation6 + $0x1], 1 }
 0x3ae   :  { %1139 = vsyncpa [#allocation9], 1 }
 0x3af   :  { %1140 = vsyncpa [#allocation4], 1 }
 0x3b0   :  { %1142 = vsyncpa [#allocation4 + $0x1], 1 }

</bundles_post_ra>
